<compile_context>
chip_gen: v5e
topology: v5e:2x2
jax: 0.10.0
libtpu: 0.0.40
codegen_flags: <defaults>
</compile_context>

<pallas_src>
import math

import jax
import jax.numpy as jnp
from jax.experimental import pallas as pl
from jax.experimental.pallas import tpu as pltpu


# --------------------------------------------------------------------------- #
# Kernel
# --------------------------------------------------------------------------- #
def attention_kernel(x_ref, w_ref, b_ref, u_ref, out_ref):
    # x_ref:   (TB, S, F)      block of batch rows (f32 or bf16)
    # w_ref:   (F, C)           same dtype as x (bf16 stays bf16 for the MXU)
    # b_ref:   (S, C)  f32
    # u_ref:   (1, C)  f32      context vector, lane-major
    # out_ref: (TB // P, P * F) lane-dense (row-packed) output block
    TB, S, F = x_ref.shape
    x_raw = x_ref[...]

    # --- single big MXU matmul: fold batch into M ---------------------------
    # bf16 LHS/RHS use the native bf16 MXU path on v6e/v7x; f32 accumulate.
    eij = jnp.dot(x_raw.reshape(TB * S, F), w_ref[...],
                  preferred_element_type=jnp.float32)                  # (TB*S, C)
    eij = jnp.tanh(eij.reshape(TB, S, -1) + b_ref[...][None, :, :])    # (TB, S, C)

    # --- scores: rank-1 contraction on VPU (mul) + XLU (lane reduce) --------
    scores = jnp.sum(eij * u_ref[...][None, :, :], axis=-1,
                     keepdims=True)                                    # (TB, S, 1)

    # Softmax over the step dim.  Max-subtraction is mathematically identical
    # to the reference's raw exp / sum but cannot overflow to inf/NaN.
    m = jnp.max(scores, axis=1, keepdims=True)                         # (TB, 1, 1)
    v = jnp.exp(scores - m)                                            # (TB, S, 1)
    denom = jnp.sum(v, axis=1, keepdims=True)                          # (TB, 1, 1)
    v = v * pl.reciprocal(denom)          # exact reciprocal keeps 1e-5 tolerance

    # --- weighted sum over step: VPU broadcast-mul + sublane reduce ---------
    s = jnp.sum(x_raw.astype(jnp.float32) * v, axis=1)                 # (TB, F)

    # Row-packed, lane-dense store (out_ref.shape == (TB // P, P * F)).
    out_ref[...] = s.reshape(out_ref.shape).astype(out_ref.dtype)


# --------------------------------------------------------------------------- #
# Generation-aware tiling heuristics
# --------------------------------------------------------------------------- #
def _vmem_budget_bytes():
    """(x-tile double-buffer budget, vmem_limit_bytes) for this chip generation."""
    try:
        vmem = int(pltpu.get_tpu_info().vmem_capacity_bytes)
    except Exception:  # pragma: no cover - conservative generic fallback
        vmem = 128 << 20  # v5e/v6e physical VMEM
    # Leave headroom for params, output double-buffer and compiler scratch.
    # 128 MiB chips (v5e/v6e): limit ~96 MiB, x budget ~48 MiB.
    # 64 MiB chips  (v7x):     limit ~48 MiB, x budget ~24 MiB.
    vmem_limit = min(int(vmem * 0.75), 128 << 20)
    x_budget = vmem_limit // 2
    return x_budget, vmem_limit


def _min_grid_steps():
    """v7x has 2 TensorCores per chip: keep >=2 'parallel' grid steps there.
    Single-TC chips (v5e/v6e) prefer one big step (extra steps = pure overhead)."""
    try:
        kind = jax.devices()[0].device_kind.lower()
        if "v7" in kind or "tpu7" in kind:
            return 2
    except Exception:  # pragma: no cover
        pass
    return 1


def _pick_block_batch(B, S, F, itemsize, budget, min_steps):
    """Batch rows per grid step: biggest sublane-aligned tile that fits VMEM."""
    row_bytes = max(S * F * itemsize, 1)
    fits = lambda tb: 2 * tb * row_bytes <= budget  # double-buffered x tile

    # Whole batch in one step when it fits and splitting buys nothing
    # (single-TC chip, or B too small to split into multiple-of-8 blocks).
    if fits(B) and (min_steps == 1 or B < 16):
        return B

    # Largest multiple-of-8 divisor keeping >= min_steps steps; prefer TB*S a
    # multiple of 256 (full MXU passes) when it doesn't cost much tile size.
    best, best_mxu = 0, 0
    for tb in range(8, B // min_steps + 1, 8):
        if B % tb == 0 and fits(tb):
            best = tb
            if (tb * S) % 256 == 0:
                best_mxu = tb
    if best_mxu and 2 * best_mxu >= best:
        return best_mxu
    if best:
        return best
    if fits(B):
        return B
    # Last resort: any divisor that fits (may cost masked sublane stores).
    for tb in range(B, 0, -1):
        if B % tb == 0 and fits(tb):
            return tb
    return 1


def _pick_row_pack(TB, F, B):
    """Batch rows packed per output row so the final store is lane-dense."""
    if F % 128 == 0:
        return 1
    p = 128 // math.gcd(F, 128)  # minimal p with (p * F) % 128 == 0
    if TB % p == 0 and ((TB // p) % 8 == 0 or TB == B):
        return p
    return 1


# --------------------------------------------------------------------------- #
# Wrapper
# --------------------------------------------------------------------------- #
def attention_forward(x, weight, b, u, *, block_batch=None):
    B, S, F = x.shape
    Fw, C = weight.shape
    assert Fw == F and b.shape == (S, C) and u.shape == (C, 1)

    budget, vmem_limit = _vmem_budget_bytes()
    min_steps = _min_grid_steps()
    TB = (_pick_block_batch(B, S, F, x.dtype.itemsize, budget, min_steps)
          if block_batch is None else block_batch)
    assert B % TB == 0, "block_batch must divide the batch size"
    assert TB == B or TB % 8 == 0, \
        "block_batch must be a multiple of 8 or the full batch"

    # Rows packed per output row => lane-dense (multiple-of-128) final store.
    P = _pick_row_pack(TB, F, B)

    # MXU inputs keep x's dtype (bf16 stays bf16 on v6e/v7x); elementwise
    # params stay f32 everywhere (v5e has no bf16 VPU/EUP).
    mxu_dtype = x.dtype if x.dtype == jnp.bfloat16 else jnp.float32
    w_in = weight.astype(mxu_dtype)
    b_in = b.astype(jnp.float32)
    u_row = u.reshape(1, C).astype(jnp.float32)  # lane-major context vector

    out_packed = pl.pallas_call(
        attention_kernel,
        out_shape=jax.ShapeDtypeStruct((B // P, P * F), x.dtype),
        grid_spec=pltpu.PrefetchScalarGridSpec(
            num_scalar_prefetch=0,
            grid=(B // TB,),
            in_specs=[
                pl.BlockSpec((TB, S, F), lambda i: (i, 0, 0)),
                pl.BlockSpec((F, C), lambda i: (0, 0)),
                pl.BlockSpec((S, C), lambda i: (0, 0)),
                pl.BlockSpec((1, C), lambda i: (0, 0)),
            ],
            out_specs=pl.BlockSpec((TB // P, P * F), lambda i: (i, 0)),
        ),
        compiler_params=pltpu.CompilerParams(
            dimension_semantics=("parallel",),
            vmem_limit_bytes=vmem_limit,
        ),
    )(x, w_in, b_in, u_row)

    return out_packed.reshape(B, F)


# --------------------------------------------------------------------------- #
# Reference + init (mirrors the PyTorch module)
# --------------------------------------------------------------------------- #
def init_params(key, feature_dim, step_dim, context_dim):
    """kaiming_uniform_ (a=0): bound = sqrt(6 / fan_in), fan_in = size(1)."""
    k_w, k_u = jax.random.split(key)
    bound_w = math.sqrt(6.0 / context_dim)          # weight (F, C), fan_in = C
    weight = jax.random.uniform(k_w, (feature_dim, context_dim),
                                minval=-bound_w, maxval=bound_w,
                                dtype=jnp.float32)
    b = jnp.zeros((step_dim, context_dim), dtype=jnp.float32)
    bound_u = math.sqrt(6.0 / 1.0)                  # u (C, 1), fan_in = 1
    u = jax.random.uniform(k_u, (context_dim, 1),
                           minval=-bound_u, maxval=bound_u,
                           dtype=jnp.float32)
    return weight, b, u


def attention_reference(x, weight, b, u):
    eij = jnp.tanh(jnp.matmul(x, weight) + b)
    v = jnp.exp(jnp.matmul(eij, u))
    v = v / jnp.sum(v, axis=1, keepdims=True)
    return jnp.sum(x * v, axis=1)


if __name__ == "__main__":
    # Shapes consistent with the module: batch=2, step=8, feature=32, context=16
    B, S, F, C = 2, 8, 32, 16

    key = jax.random.PRNGKey(0)
    k_x, k_p, k_x2 = jax.random.split(key, 3)
    x = jax.random.normal(k_x, (B, S, F), dtype=jnp.float32)
    weight, b, u = init_params(k_p, feature_dim=F, step_dim=S, context_dim=C)

    out = jax.block_until_ready(attention_forward(x, weight, b, u))
    ref = attention_reference(x, weight, b, u)
    assert out.shape == (B, F)
    assert jnp.allclose(out, ref, atol=1e-5, rtol=1e-5), "mismatch vs reference"

    # Larger batch: exercises the multiple-of-8 blocking and the lane-dense
    # row-packed output path (and, on v7x, the >=2-step grid split).
    B2 = 64
    x2 = jax.random.normal(k_x2, (B2, S, F), dtype=jnp.float32)
    ref2 = attention_reference(x2, weight, b, u)
    out2 = jax.block_until_ready(attention_forward(x2, weight, b, u))
    assert out2.shape == (B2, F)
    assert jnp.allclose(out2, ref2, atol=1e-5, rtol=1e-5), "large-batch mismatch"

    # Explicit multi-step grid path (8 batch rows per step).
    out3 = jax.block_until_ready(attention_forward(x2, weight, b, u,
                                                   block_batch=8))
    assert jnp.allclose(out3, ref2, atol=1e-5, rtol=1e-5), "blocked path mismatch"

    print("KERNEL_OK")
</pallas_src>

<mosaic_0001>
module attributes {stable_mosaic.version = 11 : i64} {
  func.func @attention_kernel(%arg0: i32, %arg1: memref<2x8x32xf32, #tpu.memory_space<vmem>>, %arg2: memref<32x16xf32, #tpu.memory_space<vmem>>, %arg3: memref<8x16xf32, #tpu.memory_space<vmem>>, %arg4: memref<1x16xf32, #tpu.memory_space<vmem>>, %arg5: memref<2x32xf32, #tpu.memory_space<vmem>>) attributes {dimension_semantics = [#tpu.dimension_semantics<parallel>], iteration_bounds = array<i64: 1>, scalar_prefetch = 0 : i64, scratch_operands = 0 : i64, tpu.core_type = #tpu.core_type<tc>, window_params = [{transform_indices = @transform_0, window_bounds = array<i64: 2, 8, 32>}, {pipeline_mode = #tpu.pipeline_mode<synchronous>, transform_indices = @transform_1, window_bounds = array<i64: 32, 16>}, {pipeline_mode = #tpu.pipeline_mode<synchronous>, transform_indices = @transform_2, window_bounds = array<i64: 8, 16>}, {pipeline_mode = #tpu.pipeline_mode<synchronous>, transform_indices = @transform_3, window_bounds = array<i64: 1, 16>}, {transform_indices = @transform_4, window_bounds = array<i64: 2, 32>}]} {
    %c0 = arith.constant 0 : index
    %c0_0 = arith.constant 0 : index
    %c0_1 = arith.constant 0 : index
    %0 = vector.load %arg1[%c0, %c0_0, %c0_1] : memref<2x8x32xf32, #tpu.memory_space<vmem>>, vector<2x8x32xf32>
    %1 = vector.shape_cast %0 : vector<2x8x32xf32> to vector<16x32xf32>
    %c0_2 = arith.constant 0 : index
    %c0_3 = arith.constant 0 : index
    %2 = vector.load %arg2[%c0_2, %c0_3] : memref<32x16xf32, #tpu.memory_space<vmem>>, vector<32x16xf32>
    %cst = arith.constant dense<0.000000e+00> : vector<16x16xf32>
    %3 = tpu.matmul %1, %2, %cst {dimension_numbers = #tpu.dot_dimension_numbers<[1], [0], [0], [1], [0, 0, 1, 1], [], []>} : vector<16x32xf32>, vector<32x16xf32>, vector<16x16xf32> -> vector<16x16xf32>
    %4 = vector.shape_cast %3 : vector<16x16xf32> to vector<2x8x16xf32>
    %c0_4 = arith.constant 0 : index
    %c0_5 = arith.constant 0 : index
    %5 = vector.load %arg3[%c0_4, %c0_5] : memref<8x16xf32, #tpu.memory_space<vmem>>, vector<8x16xf32>
    %6 = vector.shape_cast %5 : vector<8x16xf32> to vector<1x8x16xf32>
    %7 = vector.broadcast %6 : vector<1x8x16xf32> to vector<2x8x16xf32>
    %8 = arith.addf %4, %7 : vector<2x8x16xf32>
    %9 = math.tanh %8 : vector<2x8x16xf32>
    %c0_6 = arith.constant 0 : index
    %c0_7 = arith.constant 0 : index
    %10 = vector.load %arg4[%c0_6, %c0_7] : memref<1x16xf32, #tpu.memory_space<vmem>>, vector<1x16xf32>
    %11 = vector.shape_cast %10 : vector<1x16xf32> to vector<1x1x16xf32>
    %12 = vector.broadcast %11 : vector<1x1x16xf32> to vector<2x8x16xf32>
    %13 = arith.mulf %9, %12 : vector<2x8x16xf32>
    %cst_8 = arith.constant dense<0.000000e+00> : vector<2x8xf32>
    %14 = vector.multi_reduction <add>, %13, %cst_8 [2] : vector<2x8x16xf32> to vector<2x8xf32>
    %15 = vector.shape_cast %14 : vector<2x8xf32> to vector<2x8x1xf32>
    %cst_9 = arith.constant dense<0xFF800000> : vector<2x1xf32>
    %16 = vector.multi_reduction <maximumf>, %15, %cst_9 [1] : vector<2x8x1xf32> to vector<2x1xf32>
    %17 = vector.shape_cast %16 : vector<2x1xf32> to vector<2x1x1xf32>
    %18 = vector.broadcast %17 : vector<2x1x1xf32> to vector<2x8x1xf32>
    %19 = arith.subf %15, %18 : vector<2x8x1xf32>
    %20 = math.exp %19 : vector<2x8x1xf32>
    %cst_10 = arith.constant dense<0.000000e+00> : vector<2x1xf32>
    %21 = vector.multi_reduction <add>, %20, %cst_10 [1] : vector<2x8x1xf32> to vector<2x1xf32>
    %22 = vector.shape_cast %21 : vector<2x1xf32> to vector<2x1x1xf32>
    %23 = tpu.reciprocal %22 : vector<2x1x1xf32> -> vector<2x1x1xf32>
    %24 = vector.broadcast %23 : vector<2x1x1xf32> to vector<2x8x1xf32>
    %25 = arith.mulf %20, %24 : vector<2x8x1xf32>
    %26 = vector.broadcast %25 : vector<2x8x1xf32> to vector<2x8x32xf32>
    %27 = arith.mulf %0, %26 : vector<2x8x32xf32>
    %cst_11 = arith.constant dense<0.000000e+00> : vector<2x32xf32>
    %28 = vector.multi_reduction <add>, %27, %cst_11 [1] : vector<2x8x32xf32> to vector<2x32xf32>
    %c0_12 = arith.constant 0 : index
    %c0_13 = arith.constant 0 : index
    %29 = vector.load %arg5[%c0_12, %c0_13] : memref<2x32xf32, #tpu.memory_space<vmem>>, vector<2x32xf32>
    tpu.vector_store %arg5[%c0_12, %c0_13], %28 {strides = array<i32>} : memref<2x32xf32, #tpu.memory_space<vmem>>, vector<2x32xf32>,
    return
  }
  func.func @transform_0(%arg0: i32) -> (i32, i32, i32) {
    %c0_i32 = arith.constant 0 : i32
    %c0_i32_0 = arith.constant 0 : i32
    %c0_i32_1 = arith.constant 0 : i32
    return %arg0, %c0_i32, %c0_i32_0 : i32, i32, i32
  }
  func.func @transform_1(%arg0: i32) -> (i32, i32) {
    %c0_i32 = arith.constant 0 : i32
    %c0_i32_0 = arith.constant 0 : i32
    %c0_i32_1 = arith.constant 0 : i32
    return %c0_i32, %c0_i32_0 : i32, i32
  }
  func.func @transform_2(%arg0: i32) -> (i32, i32) {
    %c0_i32 = arith.constant 0 : i32
    %c0_i32_0 = arith.constant 0 : i32
    %c0_i32_1 = arith.constant 0 : i32
    return %c0_i32, %c0_i32_0 : i32, i32
  }
  func.func @transform_3(%arg0: i32) -> (i32, i32) {
    %c0_i32 = arith.constant 0 : i32
    %c0_i32_0 = arith.constant 0 : i32
    %c0_i32_1 = arith.constant 0 : i32
    return %c0_i32, %c0_i32_0 : i32, i32
  }
  func.func @transform_4(%arg0: i32) -> (i32, i32) {
    %c0_i32 = arith.constant 0 : i32
    %c0_i32_0 = arith.constant 0 : i32
    return %arg0, %c0_i32 : i32, i32
  }
}

</mosaic_0001>

<bundles_post_ra>
// kernel: tpu_custom_call.1
= control target key start
LH: loop header
LB: loop body
LE: loop exit
PB: predicated region body
PF: predicated region fallthrough
CT: control target
= control target key end

     0   :  { %s282_s0 = inlined_call_operand.vmem [shape: f32[2,8,32], index: 0, kind: input, shape index: {}]   ;;  %s283_s1 = inlined_call_operand.vmem [shape: f32[32,16], index: 1, kind: input, shape index: {}]   ;;  %s284_s2 = inlined_call_operand.vmem [shape: f32[8,16], index: 2, kind: input, shape index: {}]   ;;  %s285_s3 = inlined_call_operand.vmem [shape: f32[1,16], index: 3, kind: input, shape index: {}]   ;;  %s286_s4 = inlined_call_operand.hbm [shape: f32[2,32], index: 4, kind: output, shape index: {}]  }
   0x1   :  { %v23_v0 = vld [vmem:[%s283_s1 + $0x18] sm:$0xff]  ;;  %v22_v1 = vld [vmem:[%s283_s1 + $0x10] sm:$0xff]  ;;  %v21_v2 = vld [vmem:[%s283_s1 + $0x8] sm:$0xff] }
   0x2   :  { %43 = vmatpush.msra.mxu0 %v23_v0  ;;  %173 = vmatpush.msra.mxu1 %v23_v0 }
   0x3   :  { %9 = vsyncpa [#allocation3], 0  ;;  %v20_v3 = vld [vmem:[%s283_s1] sm:$0xff]  ;;  %vm24_vm0 = vcmask 261120   ;;  %v263_v5 = vld [vmem:[%s282_s0 + $0x8] sm:$0xff]  ;;  %vm65_vm1 = vcmask 130048  }
   0x4   :  { %44 = vmatpush.msra.mxu0 %v22_v1  ;;  %174 = vmatpush.msra.mxu1 %v22_v1  ;;  %v258_v4 = vld [vmem:[%s282_s0] sm:$0xff]  ;;  %s162_s5 = sshll.u32 %s286_s4, 4  ;;  %vm150_vm10 = vcmask 1041409   ;;  %vm153_vm11 = vcmask 254976   ;;  %s163_s5 = int_to_ptr.hbm [resolvable:$true] %s162_s5 }
   0x5   :  { %v54_v6 = vld [vmem:[%s284_s2] sm:$0xff]  ;;  %s217_s2 = smov [#allocation2]  }
   0x6   :  { %45 = vmatpush.msra.mxu0 %v21_v2  ;;  %175 = vmatpush.msra.mxu1 %v21_v2  ;;  %v178_v11 = vld [vmem:[%s285_s3] ss:$0 sm:$0xff]  ;;  %s160_s3 = sshll.u32 %s217_s2, 4  ;;  %s161_s3 = int_to_ptr.vmem [resolvable:$true] %s160_s3 }
   0x8   :  { %46 = vmatpush.msra.mxu0 %v20_v3  ;;  %176 = vmatpush.msra.mxu1 %v20_v3 }
   0x9   :  { %171 = vmatmul.msk.f32.vlgmr.msra.gmra.mxu0 %vm24_vm0, %v258_v4  ;;  %172 = vmatmul.msk.f32.vlgmr.msra.gmra.mxu1 %vm24_vm0, %v263_v5 }
  0x86   :  { %v48_v7 = vpop.f32.mrf.mxu0  ;;  %v51_v8 = vpop.f32.mrf.mxu1 }
  0x87   :  { %v55_v9 = vadd.f32 %v54_v6, %v48_v7  ;;  %v56_v10 = vadd.f32 %v54_v6, %v51_v8 }
  0x89   :  { %179 = vtanh.f32 %v55_v9 }
  0x8a   :  { %181 = vtanh.f32 %v56_v10 }
  0x8f   :  { %v180_v12 = vpop.eup %179 }
  0x90   :  { %v63_v13 = vmul.f32 %v180_v12, %v178_v11  ;;  %v182_v14 = vpop.eup %181 }
  0x91   :  { %v64_v16 = vmul.f32 %v182_v14, %v178_v11 }
  0x92   :  { %v66_v15 = vsel %vm65_vm1, %v63_v13, 0.0 }
  0x93   :  { %67 = vadd.xlane.f32.xlu0 %v66_v15  ;;  %v69_v17 = vsel %vm65_vm1, %v64_v16, 0.0 }
  0x9b   :  { %70 = vadd.xlane.f32.xlu0 %v69_v17 }
 0x106   :  { %v68_v18 = vpop.xlane.xlu0 %67 }
 0x107   :  { %v72_v19 = vrot.slane %v68_v18, 4 }
 0x109   :  { %v73_v20 = vmax.f32 %v68_v18, %v72_v19 }
 0x10b   :  { %v74_v21 = vrot.slane %v73_v20, 2 }
 0x10d   :  { %v75_v22 = vmax.f32 %v73_v20, %v74_v21 }
 0x10e   :  { %v71_v23 = vpop.xlane.xlu0 %70 }
 0x10f   :  { %v76_v24 = vrot.slane %v75_v22, 1  ;;  %v78_v25 = vrot.slane %v71_v23, 4 }
 0x111   :  { %v77_v26 = vmax.f32 %v75_v22, %v76_v24  ;;  %v79_v27 = vmax.f32 %v71_v23, %v78_v25 }
 0x113   :  { %v84_v28 = vsub.f32 %v68_v18, %v77_v26  ;;  %v80_v29 = vrot.slane %v79_v27, 2 }
 0x115   :  { %v86_v30 = vmul.f32 1.442695, %v84_v28  ;;  %v81_v31 = vmax.f32 %v79_v27, %v80_v29 }
 0x117   :  { %183 = vpow2.f32 %v86_v30  ;;  %v82_v32 = vrot.slane %v81_v31, 1 }
 0x119   :  { %v83_v33 = vmax.f32 %v81_v31, %v82_v32 }
 0x11b   :  { %v85_v34 = vsub.f32 %v71_v23, %v83_v33 }
 0x11d   :  { %v184_v35 = vpop.eup %183  ;;  %v88_v36 = vmul.f32 1.442695, %v85_v34 }
 0x11e   :  { %v90_v37 = vrot.slane %v184_v35, 4 }
 0x11f   :  { %185 = vpow2.f32 %v88_v36 }
 0x120   :  { %v91_v38 = vadd.f32 %v184_v35, %v90_v37 }
 0x122   :  { %v92_v39 = vrot.slane %v91_v38, 2 }
 0x124   :  { %v93_v40 = vadd.f32 %v92_v39, %v91_v38 }
 0x125   :  { %v186_v41 = vpop.eup %185 }
 0x126   :  { %v94_v42 = vrot.slane %v93_v40, 1  ;;  %v96_v43 = vrot.slane %v186_v41, 4 }
 0x128   :  { %v95_v44 = vadd.f32 %v94_v42, %v93_v40  ;;  %v97_v45 = vadd.f32 %v186_v41, %v96_v43 }
 0x12a   :  { %187 = vrcp.f32 %v95_v44  ;;  %v98_v46 = vrot.slane %v97_v45, 2  ;;  %v113_v53 = vand.u32 2147483648, %v95_v44  ;;  %v111_v55 = vand.u32 2147483647, %v95_v44 }
 0x12b   :  { %vm107_vm3 = vweird.f32 %v95_v44 }
 0x12c   :  { %v99_v47 = vadd.f32 %v98_v46, %v97_v45  ;;  %v114_v58 = vor.u32 1.1754944e-38, %v113_v53  ;;  %vm112_vm5 = vcmp.eq.f32.partialorder %v111_v55, 8.507059e+37 }
 0x12e   :  { %v100_v48 = vrot.slane %v99_v47, 1 }
 0x130   :  { %v188_v49 = vpop.eup %187  ;;  %v101_v50 = vadd.f32 %v100_v48, %v99_v47 }
 0x131   :  { %v103_v51 = vmul.f32 %v188_v49, %v95_v44  ;;  %vm108_vm2 = vweird.f32 %v188_v49 }
 0x132   :  { %189 = vrcp.f32 %v101_v50  ;;  %vm109_vm4 = vmor %vm107_vm3, %vm108_vm2  ;;  %v127_v0 = vand.u32 2147483648, %v101_v50  ;;  %v125_v2 = vand.u32 2147483647, %v101_v50  ;;  %vm121_vm7 = vweird.f32 %v101_v50 }
 0x133   :  { %v104_v52 = vsub.f32 1.0, %v103_v51 }
 0x134   :  { %v128_v8 = vor.u32 1.1754944e-38, %v127_v0  ;;  %vm126_vm9 = vcmp.eq.f32.partialorder %v125_v2, 8.507059e+37 }
 0x135   :  { %v105_v54 = vmul.f32 %v188_v49, %v104_v52 }
 0x137   :  { %v106_v56 = vadd.f32 %v188_v49, %v105_v54 }
 0x138   :  { %v190_v57 = vpop.eup %189 }
 0x139   :  { %v110_v59 = vsel %vm109_vm4, %v188_v49, %v106_v56  ;;  %v117_v60 = vmul.f32 %v190_v57, %v101_v50  ;;  %vm122_vm6 = vweird.f32 %v190_v57 }
 0x13a   :  { %v115_v61 = vsel %vm112_vm5, %v114_v58, %v110_v59  ;;  %vm123_vm8 = vmor %vm121_vm7, %vm122_vm6 }
 0x13b   :  { %v118_v62 = vsub.f32 1.0, %v117_v60  ;;  %v130_v63 = vmul.f32 %v184_v35, %v115_v61 }
 0x13d   :  { %v119_v1 = vmul.f32 %v190_v57, %v118_v62  ;;  %v132_v3 = vmul.f32 %v130_v63, %v258_v4 }
 0x13f   :  { %v120_v6 = vadd.f32 %v190_v57, %v119_v1  ;;  %v134_v7 = vsel %vm24_vm0, %v132_v3, 0.0 }
 0x140   :  { %v135_v9 = vrot.slane %v134_v7, 4 }
 0x141   :  { %v124_v10 = vsel %vm123_vm8, %v190_v57, %v120_v6 }
 0x142   :  { %v129_v11 = vsel %vm126_vm9, %v128_v8, %v124_v10  ;;  %v136_v12 = vadd.f32 %v135_v9, %v134_v7 }
 0x143   :  { %v131_v13 = vmul.f32 %v186_v41, %v129_v11 }
 0x144   :  { %v137_v15 = vrot.slane %v136_v12, 2 }
 0x145   :  { %v133_v14 = vmul.f32 %v131_v13, %v263_v5 }
 0x146   :  { %v138_v18 = vadd.f32 %v137_v15, %v136_v12 }
 0x147   :  { %v141_v16 = vsel %vm24_vm0, %v133_v14, 0.0 }
 0x148   :  { %v142_v17 = vrot.slane %v141_v16, 4  ;;  %v139_v20 = vrot.slane %v138_v18, 1 }
 0x14a   :  { %v143_v4 = vadd.f32 %v142_v17, %v141_v16  ;;  %v140_v23 = vadd.f32 %v139_v20, %v138_v18 }
 0x14c   :  { %v144_v19 = vrot.slane %v143_v4, 2 }
 0x14e   :  { %v145_v21 = vadd.f32 %v144_v19, %v143_v4 }
 0x150   :  { %v146_v22 = vrot.slane %v145_v21, 1 }
 0x152   :  { %v147_v24 = vadd.f32 %v146_v22, %v145_v21 }
 0x154   :  { %v151_v5 = vsel %vm150_vm10, %v147_v24, %v140_v23 }
 0x155   :  { %154 = vst.msk [vmem:[#allocation2] sm:$0x3] %vm153_vm11, %v151_v5 }
 0x156   :  { %165 = dma.vmem_to_hbm [thread:$0]  %s161_s3, 32, %s163_s5, [#allocation3]  }
 0x157   :  { %215 = dma.done.wait [#allocation3], 32  }
 0x158   :  { %216 = vsyncadd [#allocation3], 4294967264 }
 0x159   :  { %170 = vsyncpa [#allocation3], 1 }

</bundles_post_ra>
